<compile_context>
chip_gen: v6e
topology: v6e:2x2x1
jax: 0.10.0
libtpu: 0.0.40
codegen_flags: <defaults>
</compile_context>

<pallas_src>
import functools

import numpy as np
import jax
import jax.numpy as jnp
from jax.experimental import pallas as pl
from jax.experimental.pallas import tpu as pltpu


# ---------------------------------------------------------------------------
# Fused Pallas kernel: conv1 + ELU + conv2 + mean-pool
# ---------------------------------------------------------------------------
def fused_gat_kernel(x_ref, adj_ref, w1_ref, att1_ref, b1_ref, head_mask_ref,
                     w2_ref, att2_ref, b2_ref, out_ref, *,
                     heads, c1, c2, negative_slope=0.2):
    neg_inf = jnp.float32(-1e30)

    x = x_ref[...]                                   # [N, F_in]
    adj = adj_ref[...]                               # [N, N] (dst, src) incl. self-loops
    mask = adj > 0.0                                 # hoisted: shared by all heads & both layers

    # ----- layer 1: GATConv(F_in -> c1, heads=H, concat) --------------------
    xp1 = jnp.dot(x, w1_ref[...], preferred_element_type=jnp.float32)         # [N, H*C1]
    # all-head attention coefficients in ONE MXU matmul (att1 is block-diagonal)
    alpha1 = jnp.dot(xp1, att1_ref[...], preferred_element_type=jnp.float32)  # [N, 2H]
    a_src1 = alpha1[:, :heads]                       # [N, H]
    a_dst1 = alpha1[:, heads:]                       # [N, H]
    a_src1_t = a_src1.T                              # [H, N]  single transpose for all heads

    attn_heads = []
    for h in range(heads):                           # static unroll over heads (tiny [N,N] blocks)
        logits = a_dst1[:, h:h + 1] + a_src1_t[h:h + 1, :]                    # [N, N]
        logits = jnp.where(logits > 0, logits, negative_slope * logits)       # LeakyReLU(0.2)
        masked = jnp.where(mask, logits, neg_inf)                             # single masking mechanism
        m = jnp.max(masked, axis=1, keepdims=True)
        e = jnp.exp(masked - m)
        denom = jnp.maximum(jnp.sum(e, axis=1, keepdims=True), jnp.float32(1e-20))
        attn_heads.append(e * pl.reciprocal(denom, approx=True))              # [N, N]
    attn1 = jnp.concatenate(attn_heads, axis=1)      # [N, H*N]

    # one block-diagonal aggregation matmul for all heads:
    #   q[h*N + j, h*C1 + c] = xp1[j, h*C1 + c]  (zero outside the diagonal head block)
    q = jnp.concatenate([xp1] * heads, axis=0) * head_mask_ref[...]           # [H*N, H*C1]
    h1 = jnp.dot(attn1, q, preferred_element_type=jnp.float32) + b1_ref[...]  # [N, H*C1]
    h1 = jnp.where(h1 > 0, h1, jnp.exp(jnp.minimum(h1, 0.0)) - 1.0)           # ELU
    # F.dropout(p=0.2) is identity in eval mode.

    # ----- layer 2: GATConv(H*C1 -> c2, heads=1) ----------------------------
    xp2 = jnp.dot(h1, w2_ref[...], preferred_element_type=jnp.float32)        # [N, C2]
    alpha2 = jnp.dot(xp2, att2_ref[...], preferred_element_type=jnp.float32)  # [N, 2] (src, dst)
    logits2 = alpha2[:, 1:2] + alpha2[:, 0:1].T                               # [N, N]
    logits2 = jnp.where(logits2 > 0, logits2, negative_slope * logits2)
    masked2 = jnp.where(mask, logits2, neg_inf)
    m2 = jnp.max(masked2, axis=1, keepdims=True)
    e2 = jnp.exp(masked2 - m2)
    denom2 = jnp.maximum(jnp.sum(e2, axis=1, keepdims=True), jnp.float32(1e-20))
    attn2 = e2 * pl.reciprocal(denom2, approx=True)
    h2 = jnp.dot(attn2, xp2, preferred_element_type=jnp.float32) + b2_ref[...]  # [N, C2]

    # mean over nodes; write a lane-dense padded row (wrapper slices [:c2])
    pooled = jnp.mean(h2, axis=0, keepdims=True)                              # [1, C2]
    pad = out_ref.shape[1] - c2
    if pad:
        pooled = jnp.concatenate([pooled, jnp.zeros((1, pad), jnp.float32)], axis=1)
    out_ref[...] = pooled


def gat_model_forward(x, adj, prep, *, heads, hidden_dim):
    """Fused 2-layer GAT forward.  x: [N, F_in], adj: [N, N] dense (dst, src)."""
    c1 = c2 = hidden_dim
    out_pad = ((c2 + 127) // 128) * 128              # lane-dense output slab
    kernel = functools.partial(fused_gat_kernel, heads=heads, c1=c1, c2=c2)
    vmem = pl.BlockSpec(memory_space=pltpu.MemorySpace.VMEM)
    out = pl.pallas_call(
        kernel,
        out_shape=jax.ShapeDtypeStruct((1, out_pad), jnp.float32),
        in_specs=[vmem] * 9,
        out_specs=vmem,
    )(x, adj, prep["w1"], prep["att1"], prep["b1"], prep["head_mask"],
      prep["w2"], prep["att2"], prep["b2"])
    return out[0, :c2]                               # [hidden_dim]


# ---------------------------------------------------------------------------
# Parameters, one-time packing and adjacency construction (outside hot path)
# ---------------------------------------------------------------------------
def glorot(key, shape):
    fan_in, fan_out = shape[-2], shape[-1]
    lim = jnp.sqrt(6.0 / (fan_in + fan_out))
    return jax.random.uniform(key, shape, jnp.float32, -lim, lim)


def init_gat_model(key, node_dim, hidden_dim, heads):
    ks = jax.random.split(key, 6)
    return {
        # conv1: in=node_dim, out=hidden_dim, heads=heads, concat
        "w1": glorot(ks[0], (node_dim, heads * hidden_dim)),
        "att_src1": glorot(ks[1], (heads, hidden_dim)),
        "att_dst1": glorot(ks[2], (heads, hidden_dim)),
        "b1": jnp.zeros((1, heads * hidden_dim), jnp.float32),
        # conv2: in=hidden_dim*heads, out=hidden_dim, heads=1
        "w2": glorot(ks[3], (heads * hidden_dim, hidden_dim)),
        "att_src2": glorot(ks[4], (1, hidden_dim)),
        "att_dst2": glorot(ks[5], (1, hidden_dim)),
        "b2": jnp.zeros((1, hidden_dim), jnp.float32),
    }


def prepare_kernel_params(params, *, heads, hidden_dim, num_nodes):
    """Pack attention vectors into block-diagonal matmul operands (run once)."""
    H, C, N = heads, hidden_dim, num_nodes
    att1 = np.zeros((H * C, 2 * H), np.float32)
    for h in range(H):
        att1[h * C:(h + 1) * C, h] = np.asarray(params["att_src1"][h])
        att1[h * C:(h + 1) * C, H + h] = np.asarray(params["att_dst1"][h])
    att2 = jnp.stack([params["att_src2"][0], params["att_dst2"][0]], axis=1)   # [C, 2]
    row_head = np.arange(H * N) // N
    col_head = np.arange(H * C) // C
    head_mask = (row_head[:, None] == col_head[None, :]).astype(np.float32)   # [H*N, H*C]
    return {"w1": params["w1"], "att1": jnp.asarray(att1), "b1": params["b1"],
            "head_mask": jnp.asarray(head_mask),
            "w2": params["w2"], "att2": att2, "b2": params["b2"]}


def build_adjacency(edge_index, num_nodes):
    """adj[dst, src] = 1 for every edge src->dst, plus self-loops.  Built once per graph."""
    src = np.asarray(edge_index[0])
    dst = np.asarray(edge_index[1])
    adj = np.zeros((num_nodes, num_nodes), np.float32)
    adj[dst, src] = 1.0
    np.fill_diagonal(adj, 1.0)
    return jnp.asarray(adj)


# ---------------------------------------------------------------------------
# Pure-JAX reference (same math) for correctness checking
# ---------------------------------------------------------------------------
def gat_layer_ref(x, w, att_src, att_dst, adj, bias, *, heads, out_dim,
                  apply_elu, reduce_mean, negative_slope=0.2):
    xp = x @ w
    outs = []
    for h in range(heads):
        xh = xp[:, h * out_dim:(h + 1) * out_dim]
        a_src = jnp.sum(xh * att_src[h:h + 1, :], axis=1, keepdims=True)
        a_dst = jnp.sum(xh * att_dst[h:h + 1, :], axis=1, keepdims=True)
        logits = a_dst + a_src.T
        logits = jnp.where(logits > 0, logits, negative_slope * logits)
        masked = jnp.where(adj > 0, logits, -1e30)
        m = jnp.max(masked, axis=1, keepdims=True)
        e = jnp.exp(masked - m)
        attn = e / jnp.sum(e, axis=1, keepdims=True)
        outs.append(attn @ xh)
    out = jnp.concatenate(outs, axis=1) + bias
    if apply_elu:
        out = jnp.where(out > 0, out, jnp.exp(jnp.minimum(out, 0.0)) - 1.0)
    if reduce_mean:
        out = jnp.mean(out, axis=0, keepdims=True)
    return out


def gat_model_ref(params, x, adj, *, hidden_dim, heads):
    h1 = gat_layer_ref(x, params["w1"], params["att_src1"], params["att_dst1"],
                       adj, params["b1"], heads=heads, out_dim=hidden_dim,
                       apply_elu=True, reduce_mean=False)
    out = gat_layer_ref(h1, params["w2"], params["att_src2"], params["att_dst2"],
                        adj, params["b2"], heads=1, out_dim=hidden_dim,
                        apply_elu=False, reduce_mean=True)
    return out[0]


# ---------------------------------------------------------------------------
if __name__ == "__main__":
    NODE_DIM, HIDDEN_DIM, HEADS = 15, 32, 4
    NUM_NODES = 16

    key = jax.random.PRNGKey(0)
    k_param, k_x = jax.random.split(key)
    params = init_gat_model(k_param, NODE_DIM, HIDDEN_DIM, HEADS)

    # data.x : [N, node_dim]
    x = jax.random.normal(k_x, (NUM_NODES, NODE_DIM), jnp.float32)
    # data.edge_index : [2, E]  (deterministic ring + chord graph)
    src = jnp.concatenate([jnp.arange(NUM_NODES), jnp.arange(NUM_NODES)])
    dst = jnp.concatenate([(jnp.arange(NUM_NODES) + 1) % NUM_NODES,
                           (jnp.arange(NUM_NODES) + 3) % NUM_NODES])
    edge_index = jnp.stack([src, dst]).astype(jnp.int32)

    # One-time setup (graph is static): dense adjacency + packed attention operands.
    adj = build_adjacency(edge_index, NUM_NODES)
    prep = prepare_kernel_params(params, heads=HEADS, hidden_dim=HIDDEN_DIM,
                                 num_nodes=NUM_NODES)

    out = gat_model_forward(x, adj, prep, heads=HEADS, hidden_dim=HIDDEN_DIM)
    out = jax.block_until_ready(out)
    assert out.shape == (HIDDEN_DIM,)

    ref = gat_model_ref(params, x, adj, hidden_dim=HIDDEN_DIM, heads=HEADS)
    assert jnp.allclose(out, ref, rtol=2e-3, atol=2e-3), \
        "Pallas output mismatch vs JAX reference"

    print("KERNEL_OK")
</pallas_src>

<mosaic_0001>
module attributes {stable_mosaic.version = 11 : i64} {
  func.func @fused_gat_kernel(%arg0: memref<16x15xf32, #tpu.memory_space<vmem>>, %arg1: memref<16x16xf32, #tpu.memory_space<vmem>>, %arg2: memref<15x128xf32, #tpu.memory_space<vmem>>, %arg3: memref<128x8xf32, #tpu.memory_space<vmem>>, %arg4: memref<1x128xf32, #tpu.memory_space<vmem>>, %arg5: memref<64x128xf32, #tpu.memory_space<vmem>>, %arg6: memref<128x32xf32, #tpu.memory_space<vmem>>, %arg7: memref<32x2xf32, #tpu.memory_space<vmem>>, %arg8: memref<1x32xf32, #tpu.memory_space<vmem>>, %arg9: memref<1x128xf32, #tpu.memory_space<vmem>>) attributes {dimension_semantics = [], scalar_prefetch = 0 : i64, scratch_operands = 0 : i64, tpu.core_type = #tpu.core_type<tc>} {
    %c0 = arith.constant 0 : index
    %c0_0 = arith.constant 0 : index
    %0 = vector.load %arg0[%c0, %c0_0] : memref<16x15xf32, #tpu.memory_space<vmem>>, vector<16x15xf32>
    %c0_1 = arith.constant 0 : index
    %c0_2 = arith.constant 0 : index
    %1 = vector.load %arg1[%c0_1, %c0_2] : memref<16x16xf32, #tpu.memory_space<vmem>>, vector<16x16xf32>
    %cst = arith.constant 0.000000e+00 : f32
    %2 = vector.broadcast %cst : f32 to vector<16x16xf32>
    %3 = arith.cmpf ogt, %1, %2 : vector<16x16xf32>
    %c0_3 = arith.constant 0 : index
    %c0_4 = arith.constant 0 : index
    %4 = vector.load %arg2[%c0_3, %c0_4] : memref<15x128xf32, #tpu.memory_space<vmem>>, vector<15x128xf32>
    %cst_5 = arith.constant dense<0.000000e+00> : vector<16x128xf32>
    %5 = tpu.matmul %0, %4, %cst_5 {dimension_numbers = #tpu.dot_dimension_numbers<[1], [0], [0], [1], [0, 0, 1, 1], [], []>} : vector<16x15xf32>, vector<15x128xf32>, vector<16x128xf32> -> vector<16x128xf32>
    %c0_6 = arith.constant 0 : index
    %c0_7 = arith.constant 0 : index
    %6 = vector.load %arg3[%c0_6, %c0_7] : memref<128x8xf32, #tpu.memory_space<vmem>>, vector<128x8xf32>
    %cst_8 = arith.constant dense<0.000000e+00> : vector<16x8xf32>
    %7 = tpu.matmul %5, %6, %cst_8 {dimension_numbers = #tpu.dot_dimension_numbers<[1], [0], [0], [1], [0, 0, 1, 1], [], []>} : vector<16x128xf32>, vector<128x8xf32>, vector<16x8xf32> -> vector<16x8xf32>
    %8 = vector.extract_strided_slice %7 {offsets = [0, 0], sizes = [16, 4], strides = [1, 1]} : vector<16x8xf32> to vector<16x4xf32>
    %9 = vector.extract_strided_slice %7 {offsets = [0, 4], sizes = [16, 4], strides = [1, 1]} : vector<16x8xf32> to vector<16x4xf32>
    %10 = tpu.transpose %8, [1, 0] : vector<16x4xf32> -> vector<4x16xf32>
    %11 = vector.extract_strided_slice %9 {offsets = [0, 0], sizes = [16, 1], strides = [1, 1]} : vector<16x4xf32> to vector<16x1xf32>
    %12 = vector.extract_strided_slice %10 {offsets = [0, 0], sizes = [1, 16], strides = [1, 1]} : vector<4x16xf32> to vector<1x16xf32>
    %13 = vector.broadcast %11 : vector<16x1xf32> to vector<16x16xf32>
    %14 = vector.broadcast %12 : vector<1x16xf32> to vector<16x16xf32>
    %15 = arith.addf %13, %14 : vector<16x16xf32>
    %cst_9 = arith.constant 0.000000e+00 : f32
    %16 = vector.broadcast %cst_9 : f32 to vector<16x16xf32>
    %17 = arith.cmpf ogt, %15, %16 : vector<16x16xf32>
    %cst_10 = arith.constant 2.000000e-01 : f32
    %18 = vector.broadcast %cst_10 : f32 to vector<16x16xf32>
    %19 = arith.mulf %18, %15 : vector<16x16xf32>
    %20 = arith.select %17, %15, %19 : vector<16x16xi1>, vector<16x16xf32>
    %cst_11 = arith.constant -1.000000e+30 : f32
    %21 = vector.broadcast %cst_11 : f32 to vector<16x16xf32>
    %22 = arith.select %3, %20, %21 : vector<16x16xi1>, vector<16x16xf32>
    %cst_12 = arith.constant dense<0xFF800000> : vector<16xf32>
    %23 = vector.multi_reduction <maximumf>, %22, %cst_12 [1] : vector<16x16xf32> to vector<16xf32>
    %24 = vector.shape_cast %23 : vector<16xf32> to vector<16x1xf32>
    %25 = vector.broadcast %24 : vector<16x1xf32> to vector<16x16xf32>
    %26 = arith.subf %22, %25 : vector<16x16xf32>
    %27 = math.exp %26 : vector<16x16xf32>
    %cst_13 = arith.constant dense<0.000000e+00> : vector<16xf32>
    %28 = vector.multi_reduction <add>, %27, %cst_13 [1] : vector<16x16xf32> to vector<16xf32>
    %29 = vector.shape_cast %28 : vector<16xf32> to vector<16x1xf32>
    %cst_14 = arith.constant 9.99999968E-21 : f32
    %30 = vector.broadcast %cst_14 : f32 to vector<16x1xf32>
    %31 = arith.maximumf %29, %30 : vector<16x1xf32>
    %32 = tpu.reciprocal %31 {approx = true} : vector<16x1xf32> -> vector<16x1xf32>
    %33 = vector.broadcast %32 : vector<16x1xf32> to vector<16x16xf32>
    %34 = arith.mulf %27, %33 : vector<16x16xf32>
    %35 = vector.extract_strided_slice %9 {offsets = [0, 1], sizes = [16, 1], strides = [1, 1]} : vector<16x4xf32> to vector<16x1xf32>
    %36 = vector.extract_strided_slice %10 {offsets = [1, 0], sizes = [1, 16], strides = [1, 1]} : vector<4x16xf32> to vector<1x16xf32>
    %37 = vector.broadcast %35 : vector<16x1xf32> to vector<16x16xf32>
    %38 = vector.broadcast %36 : vector<1x16xf32> to vector<16x16xf32>
    %39 = arith.addf %37, %38 : vector<16x16xf32>
    %cst_15 = arith.constant 0.000000e+00 : f32
    %40 = vector.broadcast %cst_15 : f32 to vector<16x16xf32>
    %41 = arith.cmpf ogt, %39, %40 : vector<16x16xf32>
    %cst_16 = arith.constant 2.000000e-01 : f32
    %42 = vector.broadcast %cst_16 : f32 to vector<16x16xf32>
    %43 = arith.mulf %42, %39 : vector<16x16xf32>
    %44 = arith.select %41, %39, %43 : vector<16x16xi1>, vector<16x16xf32>
    %cst_17 = arith.constant -1.000000e+30 : f32
    %45 = vector.broadcast %cst_17 : f32 to vector<16x16xf32>
    %46 = arith.select %3, %44, %45 : vector<16x16xi1>, vector<16x16xf32>
    %cst_18 = arith.constant dense<0xFF800000> : vector<16xf32>
    %47 = vector.multi_reduction <maximumf>, %46, %cst_18 [1] : vector<16x16xf32> to vector<16xf32>
    %48 = vector.shape_cast %47 : vector<16xf32> to vector<16x1xf32>
    %49 = vector.broadcast %48 : vector<16x1xf32> to vector<16x16xf32>
    %50 = arith.subf %46, %49 : vector<16x16xf32>
    %51 = math.exp %50 : vector<16x16xf32>
    %cst_19 = arith.constant dense<0.000000e+00> : vector<16xf32>
    %52 = vector.multi_reduction <add>, %51, %cst_19 [1] : vector<16x16xf32> to vector<16xf32>
    %53 = vector.shape_cast %52 : vector<16xf32> to vector<16x1xf32>
    %cst_20 = arith.constant 9.99999968E-21 : f32
    %54 = vector.broadcast %cst_20 : f32 to vector<16x1xf32>
    %55 = arith.maximumf %53, %54 : vector<16x1xf32>
    %56 = tpu.reciprocal %55 {approx = true} : vector<16x1xf32> -> vector<16x1xf32>
    %57 = vector.broadcast %56 : vector<16x1xf32> to vector<16x16xf32>
    %58 = arith.mulf %51, %57 : vector<16x16xf32>
    %59 = vector.extract_strided_slice %9 {offsets = [0, 2], sizes = [16, 1], strides = [1, 1]} : vector<16x4xf32> to vector<16x1xf32>
    %60 = vector.extract_strided_slice %10 {offsets = [2, 0], sizes = [1, 16], strides = [1, 1]} : vector<4x16xf32> to vector<1x16xf32>
    %61 = vector.broadcast %59 : vector<16x1xf32> to vector<16x16xf32>
    %62 = vector.broadcast %60 : vector<1x16xf32> to vector<16x16xf32>
    %63 = arith.addf %61, %62 : vector<16x16xf32>
    %cst_21 = arith.constant 0.000000e+00 : f32
    %64 = vector.broadcast %cst_21 : f32 to vector<16x16xf32>
    %65 = arith.cmpf ogt, %63, %64 : vector<16x16xf32>
    %cst_22 = arith.constant 2.000000e-01 : f32
    %66 = vector.broadcast %cst_22 : f32 to vector<16x16xf32>
    %67 = arith.mulf %66, %63 : vector<16x16xf32>
    %68 = arith.select %65, %63, %67 : vector<16x16xi1>, vector<16x16xf32>
    %cst_23 = arith.constant -1.000000e+30 : f32
    %69 = vector.broadcast %cst_23 : f32 to vector<16x16xf32>
    %70 = arith.select %3, %68, %69 : vector<16x16xi1>, vector<16x16xf32>
    %cst_24 = arith.constant dense<0xFF800000> : vector<16xf32>
    %71 = vector.multi_reduction <maximumf>, %70, %cst_24 [1] : vector<16x16xf32> to vector<16xf32>
    %72 = vector.shape_cast %71 : vector<16xf32> to vector<16x1xf32>
    %73 = vector.broadcast %72 : vector<16x1xf32> to vector<16x16xf32>
    %74 = arith.subf %70, %73 : vector<16x16xf32>
    %75 = math.exp %74 : vector<16x16xf32>
    %cst_25 = arith.constant dense<0.000000e+00> : vector<16xf32>
    %76 = vector.multi_reduction <add>, %75, %cst_25 [1] : vector<16x16xf32> to vector<16xf32>
    %77 = vector.shape_cast %76 : vector<16xf32> to vector<16x1xf32>
    %cst_26 = arith.constant 9.99999968E-21 : f32
    %78 = vector.broadcast %cst_26 : f32 to vector<16x1xf32>
    %79 = arith.maximumf %77, %78 : vector<16x1xf32>
    %80 = tpu.reciprocal %79 {approx = true} : vector<16x1xf32> -> vector<16x1xf32>
    %81 = vector.broadcast %80 : vector<16x1xf32> to vector<16x16xf32>
    %82 = arith.mulf %75, %81 : vector<16x16xf32>
    %83 = vector.extract_strided_slice %9 {offsets = [0, 3], sizes = [16, 1], strides = [1, 1]} : vector<16x4xf32> to vector<16x1xf32>
    %84 = vector.extract_strided_slice %10 {offsets = [3, 0], sizes = [1, 16], strides = [1, 1]} : vector<4x16xf32> to vector<1x16xf32>
    %85 = vector.broadcast %83 : vector<16x1xf32> to vector<16x16xf32>
    %86 = vector.broadcast %84 : vector<1x16xf32> to vector<16x16xf32>
    %87 = arith.addf %85, %86 : vector<16x16xf32>
    %cst_27 = arith.constant 0.000000e+00 : f32
    %88 = vector.broadcast %cst_27 : f32 to vector<16x16xf32>
    %89 = arith.cmpf ogt, %87, %88 : vector<16x16xf32>
    %cst_28 = arith.constant 2.000000e-01 : f32
    %90 = vector.broadcast %cst_28 : f32 to vector<16x16xf32>
    %91 = arith.mulf %90, %87 : vector<16x16xf32>
    %92 = arith.select %89, %87, %91 : vector<16x16xi1>, vector<16x16xf32>
    %cst_29 = arith.constant -1.000000e+30 : f32
    %93 = vector.broadcast %cst_29 : f32 to vector<16x16xf32>
    %94 = arith.select %3, %92, %93 : vector<16x16xi1>, vector<16x16xf32>
    %cst_30 = arith.constant dense<0xFF800000> : vector<16xf32>
    %95 = vector.multi_reduction <maximumf>, %94, %cst_30 [1] : vector<16x16xf32> to vector<16xf32>
    %96 = vector.shape_cast %95 : vector<16xf32> to vector<16x1xf32>
    %97 = vector.broadcast %96 : vector<16x1xf32> to vector<16x16xf32>
    %98 = arith.subf %94, %97 : vector<16x16xf32>
    %99 = math.exp %98 : vector<16x16xf32>
    %cst_31 = arith.constant dense<0.000000e+00> : vector<16xf32>
    %100 = vector.multi_reduction <add>, %99, %cst_31 [1] : vector<16x16xf32> to vector<16xf32>
    %101 = vector.shape_cast %100 : vector<16xf32> to vector<16x1xf32>
    %cst_32 = arith.constant 9.99999968E-21 : f32
    %102 = vector.broadcast %cst_32 : f32 to vector<16x1xf32>
    %103 = arith.maximumf %101, %102 : vector<16x1xf32>
    %104 = tpu.reciprocal %103 {approx = true} : vector<16x1xf32> -> vector<16x1xf32>
    %105 = vector.broadcast %104 : vector<16x1xf32> to vector<16x16xf32>
    %106 = arith.mulf %99, %105 : vector<16x16xf32>
    %107 = tpu.concatenate %34, %58, %82, %106 in 1 : vector<16x16xf32>, vector<16x16xf32>, vector<16x16xf32>, vector<16x16xf32> -> vector<16x64xf32>
    %108 = tpu.concatenate %5, %5, %5, %5 in 0 : vector<16x128xf32>, vector<16x128xf32>, vector<16x128xf32>, vector<16x128xf32> -> vector<64x128xf32>
    %c0_33 = arith.constant 0 : index
    %c0_34 = arith.constant 0 : index
    %109 = vector.load %arg5[%c0_33, %c0_34] : memref<64x128xf32, #tpu.memory_space<vmem>>, vector<64x128xf32>
    %110 = arith.mulf %108, %109 : vector<64x128xf32>
    %cst_35 = arith.constant dense<0.000000e+00> : vector<16x128xf32>
    %111 = tpu.matmul %107, %110, %cst_35 {dimension_numbers = #tpu.dot_dimension_numbers<[1], [0], [0], [1], [0, 0, 1, 1], [], []>} : vector<16x64xf32>, vector<64x128xf32>, vector<16x128xf32> -> vector<16x128xf32>
    %c0_36 = arith.constant 0 : index
    %c0_37 = arith.constant 0 : index
    %112 = vector.load %arg4[%c0_36, %c0_37] : memref<1x128xf32, #tpu.memory_space<vmem>>, vector<1x128xf32>
    %113 = vector.broadcast %112 : vector<1x128xf32> to vector<16x128xf32>
    %114 = arith.addf %111, %113 : vector<16x128xf32>
    %cst_38 = arith.constant 0.000000e+00 : f32
    %115 = vector.broadcast %cst_38 : f32 to vector<16x128xf32>
    %116 = arith.cmpf ogt, %114, %115 : vector<16x128xf32>
    %cst_39 = arith.constant 0.000000e+00 : f32
    %117 = vector.broadcast %cst_39 : f32 to vector<16x128xf32>
    %118 = arith.minimumf %114, %117 : vector<16x128xf32>
    %119 = math.exp %118 : vector<16x128xf32>
    %cst_40 = arith.constant 1.000000e+00 : f32
    %120 = vector.broadcast %cst_40 : f32 to vector<16x128xf32>
    %121 = arith.subf %119, %120 : vector<16x128xf32>
    %122 = arith.select %116, %114, %121 : vector<16x128xi1>, vector<16x128xf32>
    %c0_41 = arith.constant 0 : index
    %c0_42 = arith.constant 0 : index
    %123 = vector.load %arg6[%c0_41, %c0_42] : memref<128x32xf32, #tpu.memory_space<vmem>>, vector<128x32xf32>
    %cst_43 = arith.constant dense<0.000000e+00> : vector<16x32xf32>
    %124 = tpu.matmul %122, %123, %cst_43 {dimension_numbers = #tpu.dot_dimension_numbers<[1], [0], [0], [1], [0, 0, 1, 1], [], []>} : vector<16x128xf32>, vector<128x32xf32>, vector<16x32xf32> -> vector<16x32xf32>
    %c0_44 = arith.constant 0 : index
    %c0_45 = arith.constant 0 : index
    %125 = vector.load %arg7[%c0_44, %c0_45] : memref<32x2xf32, #tpu.memory_space<vmem>>, vector<32x2xf32>
    %cst_46 = arith.constant dense<0.000000e+00> : vector<16x2xf32>
    %126 = tpu.matmul %124, %125, %cst_46 {dimension_numbers = #tpu.dot_dimension_numbers<[1], [0], [0], [1], [0, 0, 1, 1], [], []>} : vector<16x32xf32>, vector<32x2xf32>, vector<16x2xf32> -> vector<16x2xf32>
    %127 = vector.extract_strided_slice %126 {offsets = [0, 1], sizes = [16, 1], strides = [1, 1]} : vector<16x2xf32> to vector<16x1xf32>
    %128 = vector.extract_strided_slice %126 {offsets = [0, 0], sizes = [16, 1], strides = [1, 1]} : vector<16x2xf32> to vector<16x1xf32>
    %129 = tpu.transpose %128, [1, 0] : vector<16x1xf32> -> vector<1x16xf32>
    %130 = vector.broadcast %127 : vector<16x1xf32> to vector<16x16xf32>
    %131 = vector.broadcast %129 : vector<1x16xf32> to vector<16x16xf32>
    %132 = arith.addf %130, %131 : vector<16x16xf32>
    %cst_47 = arith.constant 0.000000e+00 : f32
    %133 = vector.broadcast %cst_47 : f32 to vector<16x16xf32>
    %134 = arith.cmpf ogt, %132, %133 : vector<16x16xf32>
    %cst_48 = arith.constant 2.000000e-01 : f32
    %135 = vector.broadcast %cst_48 : f32 to vector<16x16xf32>
    %136 = arith.mulf %135, %132 : vector<16x16xf32>
    %137 = arith.select %134, %132, %136 : vector<16x16xi1>, vector<16x16xf32>
    %cst_49 = arith.constant -1.000000e+30 : f32
    %138 = vector.broadcast %cst_49 : f32 to vector<16x16xf32>
    %139 = arith.select %3, %137, %138 : vector<16x16xi1>, vector<16x16xf32>
    %cst_50 = arith.constant dense<0xFF800000> : vector<16xf32>
    %140 = vector.multi_reduction <maximumf>, %139, %cst_50 [1] : vector<16x16xf32> to vector<16xf32>
    %141 = vector.shape_cast %140 : vector<16xf32> to vector<16x1xf32>
    %142 = vector.broadcast %141 : vector<16x1xf32> to vector<16x16xf32>
    %143 = arith.subf %139, %142 : vector<16x16xf32>
    %144 = math.exp %143 : vector<16x16xf32>
    %cst_51 = arith.constant dense<0.000000e+00> : vector<16xf32>
    %145 = vector.multi_reduction <add>, %144, %cst_51 [1] : vector<16x16xf32> to vector<16xf32>
    %146 = vector.shape_cast %145 : vector<16xf32> to vector<16x1xf32>
    %cst_52 = arith.constant 9.99999968E-21 : f32
    %147 = vector.broadcast %cst_52 : f32 to vector<16x1xf32>
    %148 = arith.maximumf %146, %147 : vector<16x1xf32>
    %149 = tpu.reciprocal %148 {approx = true} : vector<16x1xf32> -> vector<16x1xf32>
    %150 = vector.broadcast %149 : vector<16x1xf32> to vector<16x16xf32>
    %151 = arith.mulf %144, %150 : vector<16x16xf32>
    %cst_53 = arith.constant dense<0.000000e+00> : vector<16x32xf32>
    %152 = tpu.matmul %151, %124, %cst_53 {dimension_numbers = #tpu.dot_dimension_numbers<[1], [0], [0], [1], [0, 0, 1, 1], [], []>} : vector<16x16xf32>, vector<16x32xf32>, vector<16x32xf32> -> vector<16x32xf32>
    %c0_54 = arith.constant 0 : index
    %c0_55 = arith.constant 0 : index
    %153 = vector.load %arg8[%c0_54, %c0_55] : memref<1x32xf32, #tpu.memory_space<vmem>>, vector<1x32xf32>
    %154 = vector.broadcast %153 : vector<1x32xf32> to vector<16x32xf32>
    %155 = arith.addf %152, %154 : vector<16x32xf32>
    %cst_56 = arith.constant dense<0.000000e+00> : vector<32xf32>
    %156 = vector.multi_reduction <add>, %155, %cst_56 [0] : vector<16x32xf32> to vector<32xf32>
    %157 = vector.shape_cast %156 : vector<32xf32> to vector<1x32xf32>
    %cst_57 = arith.constant 1.600000e+01 : f32
    %158 = vector.broadcast %cst_57 : f32 to vector<1x32xf32>
    %159 = arith.divf %157, %158 : vector<1x32xf32>
    %cst_58 = arith.constant 0.000000e+00 : f32
    %160 = vector.broadcast %cst_58 : f32 to vector<1x96xf32>
    %161 = tpu.concatenate %159, %160 in 1 : vector<1x32xf32>, vector<1x96xf32> -> vector<1x128xf32>
    %c0_59 = arith.constant 0 : index
    %c0_60 = arith.constant 0 : index
    %162 = vector.load %arg9[%c0_59, %c0_60] : memref<1x128xf32, #tpu.memory_space<vmem>>, vector<1x128xf32>
    tpu.vector_store %arg9[%c0_59, %c0_60], %161 {strides = array<i32>} : memref<1x128xf32, #tpu.memory_space<vmem>>, vector<1x128xf32>,
    return
  }
}

</mosaic_0001>

<bundles_post_ra>
// kernel: tpu_custom_call.1
= control target key start
LH: loop header
LB: loop body
LE: loop exit
PB: predicated region body
PF: predicated region fallthrough
CT: control target
= control target key end

     0   :  { %vm48_vm0 = vcmask 1046528   ;;  %vm41_vm1 = vcmask 121856   ;;  %s1513_s0 = inlined_call_operand.vmem [shape: f32[16,15], index: 0, kind: input, shape index: {}]   ;;  %s1514_s1 = inlined_call_operand.vmem [shape: f32[16,16], index: 1, kind: input, shape index: {}]   ;;  %s1515_s2 = inlined_call_operand.vmem [shape: f32[15,128], index: 2, kind: input, shape index: {}]   ;;  %s1516_s3 = inlined_call_operand.vmem [shape: f32[128,8], index: 3, kind: input, shape index: {}]   ;;  %s1517_s4 = inlined_call_operand.vmem [shape: f32[1,128], index: 4, kind: input, shape index: {}]   ;;  %s1518_s5 = inlined_call_operand.vmem [shape: f32[64,128], index: 5, kind: input, shape index: {}]   ;;  %s1519_s6 = inlined_call_operand.vmem [shape: f32[128,32], index: 6, kind: input, shape index: {}]   ;;  %s1520_s7 = inlined_call_operand.vmem [shape: f32[32,2], index: 7, kind: input, shape index: {}]   ;;  %s1521_s8 = inlined_call_operand.vmem [shape: f32[1,32], index: 8, kind: input, shape index: {}]   ;;  %s1522_s9 = inlined_call_operand.hbm [shape: f32[1,128], index: 9, kind: output, shape index: {}]  }
   0x1   :  { %v40_v0 = vld [vmem:[%s1515_s2 + $0x8] sm:$0x7f]  ;;  %v39_v1 = vld [vmem:[%s1515_s2] sm:$0xff]  ;;  %v142_v4 = vld [vmem:[%s1516_s3 + $0x78] sm:$0xff] }
   0x2   :  { %v33_v2 = vld [vmem:[%s1513_s0] sm:$0xff]  ;;  %1030 = vmatprep.subr.msk.mxu1 %vm48_vm0, %v40_v0  ;;  %v34_v3 = vld [vmem:[%s1513_s0 + $0x8] sm:$0xff]  ;;  %v141_v5 = vld [vmem:[%s1516_s3 + $0x70] sm:$0xff] }
   0x3   :  { %1034 = vmatprep.mubr.msk.f32.mxu1 %vm41_vm1, %v33_v2  ;;  %1031 = vmatpush3.msk.msra.mxu1 %vm48_vm0, %v40_v0  ;;  %v140_v6 = vld [vmem:[%s1516_s3 + $0x68] sm:$0xff] }
   0x4   :  { %1032 = vmatprep.subr.mxu1 %v39_v1 }
   0x5   :  { %1033 = vmatpush3.msra.mxu1 %v39_v1 }
   0x6   :  { %1035 = vmatmul.mubr.msk.f32.vlgmr.msra.gmra.mxu1 %vm41_vm1, %v34_v3  ;;  %1037 = vmatprep.subr.mxu1 %v142_v4 }
   0x7   :  { %1038 = vmatpush3.msra.mxu1 %v142_v4 }
   0x8   :  { %14 = vsyncpa [#allocation3], 0  ;;  %1039 = vmatprep.subr.mxu1 %v141_v5  ;;  %v139_v7 = vld [vmem:[%s1516_s3 + $0x60] sm:$0xff]  ;;  %v138_v8 = vld [vmem:[%s1516_s3 + $0x58] sm:$0xff]  ;;  %v1228_v20 = vmov 6   ;;  %v1229_v21 = vmov 5   ;;  %v260_v45 = vlaneseq }
   0x9   :  { %1040 = vmatpush3.msra.mxu1 %v141_v5  ;;  %v137_v9 = vld [vmem:[%s1516_s3 + $0x50] sm:$0xff]  ;;  %v136_v10 = vld [vmem:[%s1516_s3 + $0x48] sm:$0xff]  ;;  %v135_v11 = vld [vmem:[%s1516_s3 + $0x40] sm:$0xff]  ;;  %1155 = vset.pattern.permute.xlu1 %v1228_v20  ;;  %v1230_v42 = vmov 7   ;;  %v1231_v43 = vmov 4   ;;  %vm274_vm5 = vcmask 130048  }
   0xa   :  { %1041 = vmatprep.subr.mxu1 %v140_v6  ;;  %v134_v12 = vld [vmem:[%s1516_s3 + $0x38] sm:$0xff]  ;;  %v133_v13 = vld [vmem:[%s1516_s3 + $0x30] sm:$0xff]  ;;  %v132_v14 = vld [vmem:[%s1516_s3 + $0x28] sm:$0xff]  ;;  %1154 = vset.pattern.permute.xlu0 %v1229_v21  ;;  %v1371_v47 = vshrl.u32 %v260_v45, 7  ;;  %s1233_s20 = smov 32   ;;  %s1234_s22 = smov 48  }
   0xb   :  { %1042 = vmatpush3.msra.mxu1 %v140_v6  ;;  %v131_v15 = vld [vmem:[%s1516_s3 + $0x20] sm:$0xff]  ;;  %v130_v16 = vld [vmem:[%s1516_s3 + $0x18] sm:$0xff]  ;;  %v129_v17 = vld [vmem:[%s1516_s3 + $0x10] sm:$0xff]  ;;  %vm466_vm13 = vcmask 392192   ;;  %vm463_vm14 = vcmask 261120   ;;  %vm492_vm15 = vcmask 523264  }
   0xc   :  { %1043 = vmatprep.subr.mxu1 %v139_v7  ;;  %v128_v18 = vld [vmem:[%s1516_s3 + $0x8] sm:$0xff]  ;;  %v127_v19 = vld [vmem:[%s1516_s3] sm:$0xff]  ;;  %v476_v22 = vld [vmem:[%s1518_s5 + $0x38] sm:$0xff]  ;;  %v309_v50 = vsub.s32 1, %v1371_v47  ;;  %v355_v51 = vsub.s32 2, %v1371_v47  ;;  %v401_v52 = vsub.s32 3, %v1371_v47 }
   0xd   :  { %1044 = vmatpush3.msra.mxu1 %v139_v7  ;;  %v475_v24 = vld [vmem:[%s1518_s5 + $0x30] sm:$0xff]  ;;  %v474_v27 = vld [vmem:[%s1518_s5 + $0x28] sm:$0xff]  ;;  %v473_v29 = vld [vmem:[%s1518_s5 + $0x20] sm:$0xff]  ;;  %v262_v0 = vsub.s32 0, %v1371_v47  ;;  %s1236_s14 = smov [#allocation2]  }
   0xe   :  { %1045 = vmatprep.subr.mxu1 %v138_v8  ;;  %v472_v31 = vld [vmem:[%s1518_s5 + $0x18] sm:$0xff]  ;;  %v471_v33 = vld [vmem:[%s1518_s5 + $0x10] sm:$0xff]  ;;  %v470_v35 = vld [vmem:[%s1518_s5 + $0x8] sm:$0xff]  ;;  %s949_s15 = sshll.u32 %s1236_s14, 4  ;;  %s950_s15 = int_to_ptr.vmem [resolvable:$true] %s949_s15 }
   0xf   :  { %1046 = vmatpush3.msra.mxu1 %v138_v8  ;;  %v469_v37 = vld [vmem:[%s1518_s5] sm:$0xff]  ;;  %v1379_v57 = vld [vmem:[%s1514_s1 + $0x8] sm:$0xff]  ;;  %s1210_s16 = scalar_lea.vmem %s950_s15, 32  ;;  %p1211_p1 = scmp.lt.s32.totalorder %s950_s15, %s950_s15 }
  0x10   :  { %1047 = vmatprep.subr.mxu1 %v137_v9  ;;  %v1384_v61 = vld [vmem:[%s1514_s1] sm:$0xff]  ;;  %vm38_vm2 = vcmp.gt.f32.partialorder %v1379_v57, 0.0  ;;  %s1232_s1 = smov 16  }
  0x11   :  { %1048 = vmatpush3.msra.mxu1 %v137_v9  ;;  %vm37_vm6 = vcmp.gt.f32.partialorder %v1384_v61, 0.0 }
  0x12   :  { %1049 = vmatprep.subr.mxu1 %v136_v10 }
  0x13   :  { %1050 = vmatpush3.msra.mxu1 %v136_v10 }
  0x14   :  { %1051 = vmatprep.subr.mxu1 %v135_v11 }
  0x15   :  { %1052 = vmatpush3.msra.mxu1 %v135_v11 }
  0x16   :  { %1053 = vmatprep.subr.mxu1 %v134_v12 }
  0x17   :  { %1054 = vmatpush3.msra.mxu1 %v134_v12 }
  0x18   :  { %1055 = vmatprep.subr.mxu1 %v133_v13 }
  0x19   :  { %1056 = vmatpush3.msra.mxu1 %v133_v13 }
  0x1a   :  { %1057 = vmatprep.subr.mxu1 %v132_v14 }
  0x1b   :  { %1058 = vmatpush3.msra.mxu1 %v132_v14 }
  0x1c   :  { %1059 = vmatprep.subr.mxu1 %v131_v15 }
  0x1d   :  { %1060 = vmatpush3.msra.mxu1 %v131_v15 }
  0x1e   :  { %1061 = vmatprep.subr.mxu1 %v130_v16 }
  0x1f   :  { %1062 = vmatpush3.msra.mxu1 %v130_v16 }
  0x20   :  { %1063 = vmatprep.subr.mxu1 %v129_v17 }
  0x21   :  { %1064 = vmatpush3.msra.mxu1 %v129_v17 }
  0x22   :  { %1065 = vmatprep.subr.mxu1 %v128_v18 }
  0x23   :  { %1066 = vmatpush3.msra.mxu1 %v128_v18 }
  0x24   :  { %1067 = vmatprep.subr.mxu1 %v127_v19 }
  0x25   :  { %1068 = vmatpush3.msra.mxu1 %v127_v19 }
  0xc6   :  { %v1036_v23 = vpop.f32.mrf.mxu1 }
  0xc7   :  { %v484_v25 = vmul.f32 %v1036_v23, %v476_v22  ;;  %v482_v30 = vmul.f32 %v1036_v23, %v474_v27  ;;  %v480_v34 = vmul.f32 %v1036_v23, %v472_v31  ;;  %v478_v38 = vmul.f32 %v1036_v23, %v470_v35 }
  0xc8   :  { %v118_v26 = vpop.f32.mrf.mxu1 }
  0xc9   :  { %1069 = vmatprep.mubr.f32.mxu1 %v118_v26  ;;  %1072 = vmatprep.subr.mxu0 %v484_v25  ;;  %v483_v28 = vmul.f32 %v475_v24, %v118_v26  ;;  %v481_v32 = vmul.f32 %v473_v29, %v118_v26  ;;  %v479_v36 = vmul.f32 %v471_v33, %v118_v26 }
  0xca   :  { %1070 = vmatmul.mubr.f32.vlgmr.msra.gmra.mxu1 %v1036_v23  ;;  %1073 = vmatpush3.msra.mxu0 %v484_v25  ;;  %v477_v39 = vmul.f32 %v469_v37, %v118_v26 }
  0xcb   :  { %1074 = vmatprep.subr.mxu0 %v483_v28 }
  0xcc   :  { %1075 = vmatpush3.msra.mxu0 %v483_v28 }
  0xcd   :  { %1076 = vmatprep.subr.mxu0 %v482_v30 }
  0xce   :  { %1077 = vmatpush3.msra.mxu0 %v482_v30 }
  0xcf   :  { %1078 = vmatprep.subr.mxu0 %v481_v32 }
  0xd0   :  { %1079 = vmatpush3.msra.mxu0 %v481_v32 }
  0xd1   :  { %1080 = vmatprep.subr.mxu0 %v480_v34 }
  0xd2   :  { %1081 = vmatpush3.msra.mxu0 %v480_v34 }
  0xd3   :  { %1082 = vmatprep.subr.mxu0 %v479_v36 }
  0xd4   :  { %1083 = vmatpush3.msra.mxu0 %v479_v36 }
  0xd5   :  { %1084 = vmatprep.subr.mxu0 %v478_v38 }
  0xd6   :  { %1085 = vmatpush3.msra.mxu0 %v478_v38 }
  0xd7   :  { %1086 = vmatprep.subr.mxu0 %v477_v39 }
  0xd8   :  { %1087 = vmatpush3.msra.mxu0 %v477_v39 }
 0x18a   :  { %v1071_v40 = vpop.f32.mrf.mxu1 }
 0x18b   :  { %350 = vperm.xlu1 %1155, %v1071_v40   ;;  %304 = vperm.xlu0 %1154, %v1071_v40  }
 0x18c   :  { %v209_v41 = vpop.f32.mrf.mxu1 }
 0x18f   :  { %1156 = vset.pattern.permute.xlu1 %v1230_v42  ;;  %300 = vperm.xlu0 %1154, %v209_v41  }
 0x190   :  { %396 = vperm.xlu1 %1156, %v1071_v40  }
 0x193   :  { %1158 = vset.pattern.permute.xlu0 %v1230_v42 }
 0x194   :  { %1157 = vset.pattern.permute.xlu1 %v1228_v20  ;;  %392 = vperm.xlu0 %1158, %v209_v41  }
 0x195   :  { %346 = vperm.xlu1 %1157, %v209_v41  }
 0x198   :  { %1159 = vset.pattern.permute.xlu0 %v1231_v43 }
 0x199   :  { %252 = vperm.xlu0 %1159, %v209_v41  }
 0x19d   :  { %257 = vperm.xlu0 %1159, %v1071_v40  }
 0x1be   :  { %218 = vxpose.xlu1.b32.start [1/2] (short) (narrow) %v209_v41, 8 }
 0x1c2   :  { %219 = vxpose.xlu1.b32.end [2/2] (short) (narrow) %v1071_v40, 8 }
 0x206   :  { %v351_v44 = vpop.permute.xlu1 %350  ;;  %v305_v48 = vpop.permute.xlu0 %304 }
 0x20a   :  { %v301_v53 = vpop.permute.xlu0 %300 }
 0x20b   :  { %v397_v46 = vpop.permute.xlu1 %396 }
 0x20f   :  { %v393_v3 = vpop.permute.xlu0 %392 }
 0x210   :  { %v347_v49 = vpop.permute.xlu1 %346 }
 0x214   :  { %v253_v19 = vpop.permute.xlu0 %252 }
 0x218   :  { %v258_v26 = vpop.permute.xlu0 %257 }
 0x23a   :  { %v234_v54 = vpop.trf.xlu1 }
 0x23b   :  { %v310_v55 = vrot.slane %v234_v54, %v309_v50  ;;  %v356_v56 = vrot.slane %v234_v54, %v355_v51  ;;  %v402_v58 = vrot.slane %v234_v54, %v401_v52  ;;  %v263_v15 = vrot.slane %v234_v54, %v262_v0 }
 0x23d   :  { %v312_v59 = vadd.f32 %v310_v55, %v305_v48  ;;  %v358_v60 = vadd.f32 %v356_v56, %v351_v44  ;;  %v311_v62 = vadd.f32 %v310_v55, %v301_v53  ;;  %v357_v63 = vadd.f32 %v356_v56, %v347_v49 }
 0x23e   :  { %v403_v8 = vadd.f32 %v402_v58, %v393_v3  ;;  %v404_v18 = vadd.f32 %v402_v58, %v397_v46  ;;  %v264_v24 = vadd.f32 %v263_v15, %v253_v19  ;;  %v265_v30 = vadd.f32 %v263_v15, %v258_v26 }
 0x23f   :  { %vm314_vm3 = vcmp.gt.f32.partialorder %v312_v59, 0.0  ;;  %v316_v1 = vmul.f32 0.2, %v312_v59  ;;  %vm360_vm4 = vcmp.gt.f32.partialorder %v358_v60, 0.0  ;;  %v362_v2 = vmul.f32 0.2, %v358_v60 }
 0x240   :  { %vm313_vm7 = vcmp.gt.f32.partialorder %v311_v62, 0.0  ;;  %v315_v4 = vmul.f32 0.2, %v311_v62  ;;  %v361_v7 = vmul.f32 0.2, %v357_v63  ;;  %vm359_vm8 = vcmp.gt.f32.partialorder %v357_v63, 0.0 }
 0x241   :  { %v318_v5 = vsel %vm314_vm3, %v312_v59, %v316_v1  ;;  %v364_v6 = vsel %vm360_vm4, %v358_v60, %v362_v2  ;;  %v407_v17 = vmul.f32 0.2, %v403_v8  ;;  %vm405_vm9 = vcmp.gt.f32.partialorder %v403_v8, 0.0 }
 0x242   :  { %v320_v9 = vsel %vm38_vm2, %v318_v5, -1e+30  ;;  %v366_v10 = vsel %vm38_vm2, %v364_v6, -1e+30  ;;  %v317_v11 = vsel %vm313_vm7, %v311_v62, %v315_v4  ;;  %v363_v16 = vsel %vm359_vm8, %v357_v63, %v361_v7 }
 0x243   :  { %v324_v12 = vsel %vm274_vm5, %v320_v9, -inf  ;;  %v370_v13 = vsel %vm274_vm5, %v366_v10, -inf  ;;  %v319_v14 = vsel %vm37_vm6, %v317_v11, -1e+30  ;;  %v365_v21 = vsel %vm37_vm6, %v363_v16, -1e+30 }
 0x244   :  { %325 = vmax.xlane.f32.xlu1 %v324_v12  ;;  %371 = vmax.xlane.f32.xlu0 %v370_v13  ;;  %v321_v20 = vsel %vm274_vm5, %v319_v14, -inf  ;;  %v409_v22 = vsel %vm405_vm9, %v403_v8, %v407_v17  ;;  %v408_v23 = vmul.f32 0.2, %v404_v18  ;;  %vm406_vm10 = vcmp.gt.f32.partialorder %v404_v18, 0.0 }
 0x245   :  { %v367_v25 = vsel %vm274_vm5, %v365_v21, -inf  ;;  %v411_v27 = vsel %vm37_vm6, %v409_v22, -1e+30  ;;  %v268_v29 = vmul.f32 0.2, %v264_v24  ;;  %vm266_vm11 = vcmp.gt.f32.partialorder %v264_v24, 0.0 }
 0x246   :  { %v410_v28 = vsel %vm406_vm10, %v404_v18, %v408_v23  ;;  %v413_v31 = vsel %vm274_vm5, %v411_v27, -inf  ;;  %v269_v34 = vmul.f32 0.2, %v265_v30  ;;  %vm267_vm12 = vcmp.gt.f32.partialorder %v265_v30, 0.0 }
 0x247   :  { %v412_v32 = vsel %vm38_vm2, %v410_v28, -1e+30  ;;  %v270_v33 = vsel %vm266_vm11, %v264_v24, %v268_v29 }
 0x248   :  { %322 = vmax.xlane.f32.xlu0 %v321_v20  ;;  %v416_v35 = vsel %vm274_vm5, %v412_v32, -inf  ;;  %v272_v36 = vsel %vm37_vm6, %v270_v33, -1e+30  ;;  %v271_v37 = vsel %vm267_vm12, %v265_v30, %v269_v34 }
 0x249   :  { %v275_v38 = vsel %vm274_vm5, %v272_v36, -inf  ;;  %v273_v39 = vsel %vm38_vm2, %v271_v37, -1e+30 }
 0x24a   :  { %v278_v40 = vsel %vm274_vm5, %v273_v39, -inf }
 0x24c   :  { %368 = vmax.xlane.f32.xlu0 %v367_v25 }
 0x250   :  { %414 = vmax.xlane.f32.xlu0 %v413_v31 }
 0x254   :  { %417 = vmax.xlane.f32.xlu0 %v416_v35 }
 0x258   :  { %276 = vmax.xlane.f32.xlu0 %v275_v38  ;;  %v601_v38 = vld [vmem:[%s1519_s6 + $0x78] sm:$0xff] }
 0x259   :  { %1091 = vmatprep.subr.mxu0 %v601_v38 }
 0x25c   :  { %279 = vmax.xlane.f32.xlu0 %v278_v40 }
 0x2cd   :  { %v326_v41 = vpop.xlane.xlu1 %325  ;;  %v372_v42 = vpop.xlane.xlu0 %371 }
 0x2ce   :  { %v328_v43 = vsub.f32 %v320_v9, %v326_v41  ;;  %v374_v44 = vsub.f32 %v366_v10, %v372_v42 }
 0x2d0   :  { %v331_v45 = vmul.f32 1.442695, %v328_v43  ;;  %v377_v46 = vmul.f32 1.442695, %v374_v44 }
 0x2d1   :  { %v323_v48 = vpop.xlane.xlu0 %322 }
 0x2d2   :  { %1162 = vpow2.f32 %v331_v45  ;;  %v327_v49 = vsub.f32 %v319_v14, %v323_v48 }
 0x2d3   :  { %1164 = vpow2.f32 %v377_v46 }
 0x2d4   :  { %v329_v50 = vmul.f32 1.442695, %v327_v49 }
 0x2d5   :  { %v369_v51 = vpop.xlane.xlu0 %368 }
 0x2d6   :  { %v373_v52 = vsub.f32 %v365_v21, %v369_v51  ;;  %1166 = vpow2.f32 %v329_v50 }
 0x2d8   :  { %v375_v53 = vmul.f32 1.442695, %v373_v52 }
 0x2d9   :  { %v415_v54 = vpop.xlane.xlu0 %414 }
 0x2da   :  { %v419_v55 = vsub.f32 %v411_v27, %v415_v54  ;;  %1168 = vpow2.f32 %v375_v53 }
 0x2dc   :  { %v421_v56 = vmul.f32 1.442695, %v419_v55 }
 0x2dd   :  { %v418_v58 = vpop.xlane.xlu0 %417 }
 0x2de   :  { %1170 = vpow2.f32 %v421_v56  ;;  %v420_v59 = vsub.f32 %v412_v32, %v418_v58 }
 0x2df   :  { %v1163_v60 = vpop.eup %1162 }
 0x2e0   :  { %v423_v62 = vmul.f32 1.442695, %v420_v59  ;;  %v336_v63 = vsel %vm274_vm5, %v1163_v60, 0.0  ;;  %v1165_v1 = vpop.eup %1164 }
 0x2e1   :  { %337 = vadd.xlane.f32.xlu0 %v336_v63  ;;  %v277_v2 = vpop.xlane.xlu0 %276  ;;  %v382_v5 = vsel %vm274_vm5, %v1165_v1, 0.0 }
 0x2e2   :  { %1172 = vpow2.f32 %v423_v62  ;;  %v281_v3 = vsub.f32 %v272_v36, %v277_v2 }
 0x2e3   :  { %v1167_v6 = vpop.eup %1166 }
 0x2e4   :  { %v283_v4 = vmul.f32 1.442695, %v281_v3  ;;  %v333_v10 = vsel %vm274_vm5, %v1167_v6, 0.0 }
 0x2e5   :  { %383 = vadd.xlane.f32.xlu0 %v382_v5  ;;  %v280_v7 = vpop.xlane.xlu0 %279 }
 0x2e6   :  { %1174 = vpow2.f32 %v283_v4  ;;  %v282_v8 = vsub.f32 %v273_v39, %v280_v7  ;;  %v599_v7 = vld [vmem:[%s1519_s6 + $0x68] sm:$0xff] }
 0x2e7   :  { %v1169_v11 = vpop.eup %1168 }
 0x2e8   :  { %v285_v9 = vmul.f32 1.442695, %v282_v8  ;;  %v379_v13 = vsel %vm274_vm5, %v1169_v11, 0.0  ;;  %v598_v8 = vld [vmem:[%s1519_s6 + $0x60] sm:$0xff] }
 0x2e9   :  { %334 = vadd.xlane.f32.xlu0 %v333_v10  ;;  %v596_v10 = vld [vmem:[%s1519_s6 + $0x50] sm:$0xff] }
 0x2ea   :  { %1176 = vpow2.f32 %v285_v9  ;;  %v597_v9 = vld [vmem:[%s1519_s6 + $0x58] sm:$0xff] }
 0x2eb   :  { %v1171_v12 = vpop.eup %1170 }
 0x2ec   :  { %v425_v14 = vsel %vm274_vm5, %v1171_v12, 0.0 }
 0x2ed   :  { %380 = vadd.xlane.f32.xlu0 %v379_v13  ;;  %426 = vadd.xlane.f32.xlu1 %v425_v14  ;;  %v593_v13 = vld [vmem:[%s1519_s6 + $0x38] sm:$0xff]  ;;  %v592_v14 = vld [vmem:[%s1519_s6 + $0x30] sm:$0xff] }
 0x2ef   :  { %v1173_v15 = vpop.eup %1172 }
 0x2f0   :  { %v428_v16 = vsel %vm274_vm5, %v1173_v15, 0.0 }
 0x2f1   :  { %429 = vadd.xlane.f32.xlu0 %v428_v16  ;;  %v590_v16 = vld [vmem:[%s1519_s6 + $0x20] sm:$0xff] }
 0x2f3   :  { %v1175_v17 = vpop.eup %1174 }
 0x2f4   :  { %v287_v18 = vsel %vm274_vm5, %v1175_v17, 0.0 }
 0x2f5   :  { %288 = vadd.xlane.f32.xlu1 %v287_v18  ;;  %v588_v18 = vld [vmem:[%s1519_s6 + $0x10] sm:$0xff] }
 0x2f7   :  { %v1177_v19 = vpop.eup %1176 }
 0x2f8   :  { %v290_v20 = vsel %vm274_vm5, %v1177_v19, 0.0 }
 0x2f9   :  { %291 = vadd.xlane.f32.xlu0 %v290_v20  ;;  %v680_v20 = vld [vmem:[%s1520_s7 + $0x18] sm:$0xff] }
 0x2fa   :  { %1126 = vmatprep.subr.mxu1 %v680_v20 }
 0x2fb   :  { %1127 = vmatpush3.msra.mxu1 %v680_v20 }
 0x36a   :  { %v338_v21 = vpop.xlane.xlu0 %337 }
 0x36b   :  { %v340_v22 = vmax.f32 %v338_v21, 1e-20  ;;  %v679_v21 = vld [vmem:[%s1520_s7 + $0x10] sm:$0xff] }
 0x36c   :  { %1128 = vmatprep.subr.mxu1 %v679_v21 }
 0x36d   :  { %1178 = vrcp.f32 %v340_v22  ;;  %v586_v22 = vld [vmem:[%s1519_s6] sm:$0xff]  ;;  %1129 = vmatpush3.msra.mxu1 %v679_v21 }
 0x36e   :  { %v384_v23 = vpop.xlane.xlu0 %383 }
 0x36f   :  { %v386_v24 = vmax.f32 %v384_v23, 1e-20  ;;  %v678_v23 = vld [vmem:[%s1520_s7 + $0x8] sm:$0xff] }
 0x370   :  { %1130 = vmatprep.subr.mxu1 %v678_v23 }
 0x371   :  { %1180 = vrcp.f32 %v386_v24  ;;  %v677_v24 = vld [vmem:[%s1520_s7] sm:$0xff]  ;;  %1131 = vmatpush3.msra.mxu1 %v678_v23 }
 0x372   :  { %v335_v25 = vpop.xlane.xlu0 %334  ;;  %1132 = vmatprep.subr.mxu1 %v677_v24 }
 0x373   :  { %v339_v26 = vmax.f32 %v335_v25, 1e-20  ;;  %1133 = vmatpush3.msra.mxu1 %v677_v24  ;;  %v960_v25 = vld [vmem:[%s1517_s4] ss:$0 sm:$0xff] }
 0x375   :  { %1182 = vrcp.f32 %v339_v26 }
 0x376   :  { %v427_v27 = vpop.xlane.xlu1 %426  ;;  %v381_v28 = vpop.xlane.xlu0 %380 }
 0x377   :  { %v431_v29 = vmax.f32 %v427_v27, 1e-20  ;;  %v385_v30 = vmax.f32 %v381_v28, 1e-20 }
 0x379   :  { %1184 = vrcp.f32 %v431_v29 }
 0x37a   :  { %v1179_v31 = vpop.eup %1178  ;;  %1186 = vrcp.f32 %v385_v30  ;;  %v430_v32 = vpop.xlane.xlu0 %429 }
 0x37b   :  { %v432_v33 = vmax.f32 %v430_v32, 1e-20  ;;  %v344_v34 = vmul.f32 %v1179_v31, %v1163_v60 }
 0x37d   :  { %1188 = vrcp.f32 %v432_v33  ;;  %441 = vrot.lane.b32.xlu0 %v344_v34, %s1232_s1 }
 0x37e   :  { %v1181_v35 = vpop.eup %1180  ;;  %v289_v46 = vpop.xlane.xlu1 %288 }
 0x37f   :  { %v390_v36 = vmul.f32 %v1181_v35, %v1165_v1  ;;  %v293_v48 = vmax.f32 %v289_v46, 1e-20 }
 0x381   :  { %449 = vrot.lane.b32.xlu1 %v390_v36, %s1233_s20  ;;  %1190 = vrcp.f32 %v293_v48 }
 0x382   :  { %v1183_v37 = vpop.eup %1182  ;;  %v292_v49 = vpop.xlane.xlu0 %291 }
 0x383   :  { %v343_v39 = vmul.f32 %v1183_v37, %v1167_v6  ;;  %v294_v50 = vmax.f32 %v292_v49, 1e-20  ;;  %v600_v6 = vld [vmem:[%s1519_s6 + $0x70] sm:$0xff] }
 0x385   :  { %439 = vrot.lane.b32.xlu1 %v343_v39, %s1232_s1  ;;  %1192 = vrcp.f32 %v294_v50 }
 0x386   :  { %v1185_v40 = vpop.eup %1184 }
 0x387   :  { %v1187_v41 = vpop.eup %1186  ;;  %v435_v42 = vmul.f32 %v1185_v40, %v1171_v12  ;;  %v594_v12 = vld [vmem:[%s1519_s6 + $0x40] sm:$0xff]  ;;  %v1235_v40 = vmov 1  }
 0x388   :  { %v389_v43 = vmul.f32 %v1187_v41, %v1169_v11  ;;  %v595_v11 = vld [vmem:[%s1519_s6 + $0x48] sm:$0xff]  ;;  %1161 = vset.pattern.permute.xlu1 %v1235_v40  ;;  %1160 = vset.pattern.permute.xlu0 %v1235_v40 }
 0x389   :  { %455 = vrot.lane.b32.xlu0 %v435_v42, %s1234_s22 }
 0x38a   :  { %v1189_v44 = vpop.eup %1188  ;;  %447 = vrot.lane.b32.xlu1 %v389_v43, %s1233_s20 }
 0x38b   :  { %v436_v45 = vmul.f32 %v1189_v44, %v1173_v15  ;;  %v591_v15 = vld [vmem:[%s1519_s6 + $0x28] sm:$0xff] }
 0x38e   :  { %457 = vrot.lane.b32.xlu1 %v436_v45, %s1234_s22  ;;  %v1191_v52 = vpop.eup %1190 }
 0x38f   :  { %v297_v56 = vmul.f32 %v1191_v52, %v1175_v17  ;;  %v589_v17 = vld [vmem:[%s1519_s6 + $0x18] sm:$0xff] }
 0x392   :  { %v1193_v55 = vpop.eup %1192 }
 0x393   :  { %v298_v62 = vmul.f32 %v1193_v55, %v1177_v19  ;;  %v587_v19 = vld [vmem:[%s1519_s6 + $0x8] sm:$0xff] }
 0x3ef   :  { %v442_v53 = vpop.permute.xlu0 %441 }
 0x3f0   :  { %v462_v2 = vsel %vm274_vm5, %v298_v62, %v442_v53 }
 0x3f3   :  { %v450_v51 = vpop.permute.xlu1 %449 }
 0x3f4   :  { %v465_v3 = vsel %vm463_vm14, %v462_v2, %v450_v51 }
 0x3f7   :  { %v440_v54 = vpop.permute.xlu1 %439 }
 0x3f8   :  { %v461_v59 = vsel %vm274_vm5, %v297_v56, %v440_v54 }
 0x3fb   :  { %v456_v58 = vpop.permute.xlu0 %455 }
 0x3fc   :  { %v448_v60 = vpop.permute.xlu1 %447 }
 0x3fd   :  { %v464_v63 = vsel %vm463_vm14, %v461_v59, %v448_v60 }
 0x3fe   :  { %v467_v1 = vsel %vm466_vm13, %v464_v63, %v456_v58 }
 0x3ff   :  { %1088 = vmatprep.mubr.msk.f32.mxu0 %vm492_vm15, %v467_v1 }
 0x400   :  { %v458_v4 = vpop.permute.xlu1 %457 }
 0x401   :  { %v468_v5 = vsel %vm466_vm13, %v465_v3, %v458_v4 }
 0x402   :  { %1089 = vmatmul.mubr.msk.f32.vlgmr.msra.gmra.mxu0 %vm492_vm15, %v468_v5 }
 0x403   :  { %1092 = vmatpush3.msra.mxu0 %v601_v38 }
 0x404   :  { %1093 = vmatprep.subr.mxu0 %v600_v6 }
 0x405   :  { %1094 = vmatpush3.msra.mxu0 %v600_v6 }
 0x406   :  { %1095 = vmatprep.subr.mxu0 %v599_v7 }
 0x407   :  { %1096 = vmatpush3.msra.mxu0 %v599_v7 }
 0x408   :  { %1097 = vmatprep.subr.mxu0 %v598_v8 }
 0x409   :  { %1098 = vmatpush3.msra.mxu0 %v598_v8 }
 0x40a   :  { %1099 = vmatprep.subr.mxu0 %v597_v9 }
 0x40b   :  { %1100 = vmatpush3.msra.mxu0 %v597_v9 }
 0x40c   :  { %1101 = vmatprep.subr.mxu0 %v596_v10 }
 0x40d   :  { %1102 = vmatpush3.msra.mxu0 %v596_v10 }
 0x40e   :  { %1103 = vmatprep.subr.mxu0 %v595_v11 }
 0x40f   :  { %1104 = vmatpush3.msra.mxu0 %v595_v11 }
 0x410   :  { %1105 = vmatprep.subr.mxu0 %v594_v12 }
 0x411   :  { %1106 = vmatpush3.msra.mxu0 %v594_v12 }
 0x412   :  { %1107 = vmatprep.subr.mxu0 %v593_v13 }
 0x413   :  { %1108 = vmatpush3.msra.mxu0 %v593_v13  ;;  %v967_v13 = vld [vmem:[%s1521_s8] ss:$0 sm:$0xff]  ;;  %s1206_s8 = scalar_lea.vmem %s950_s15, 16 }
 0x414   :  { %1109 = vmatprep.subr.mxu0 %v592_v14  ;;  %p1207_p0 = scmp.ne.s32.totalorder %s950_s15, %s1206_s8  ;;  %p1212_p2 = scmp.lt.s32.totalorder %s1210_s16, %s1206_s8 }
 0x415   :  { %1110 = vmatpush3.msra.mxu0 %v592_v14 }
 0x416   :  { %1111 = vmatprep.subr.mxu0 %v591_v15  ;;  %p1213_p3 = por %p1212_p2, %p1211_p1 }
 0x417   :  { %1112 = vmatpush3.msra.mxu0 %v591_v15 }
 0x418   :  { %1113 = vmatprep.subr.mxu0 %v590_v16  ;;  %p1214_p4 = pnand %p1213_p3, %p1207_p0 }
 0x419   :  { %1114 = vmatpush3.msra.mxu0 %v590_v16 }
 0x41a   :  { %1115 = vmatprep.subr.mxu0 %v589_v17 }
 0x41b   :  { %1116 = vmatpush3.msra.mxu0 %v589_v17 }
 0x41c   :  { %1117 = vmatprep.subr.mxu0 %v588_v18 }
 0x41d   :  { %1118 = vmatpush3.msra.mxu0 %v588_v18 }
 0x41e   :  { %1119 = vmatprep.subr.mxu0 %v587_v19 }
 0x41f   :  { %1120 = vmatpush3.msra.mxu0 %v587_v19 }
 0x420   :  { %1121 = vmatprep.subr.mxu0 %v586_v22 }
 0x421   :  { %1122 = vmatpush3.msra.mxu0 %v586_v22 }
 0x4c2   :  { %v1090_v26 = vpop.f32.mrf.mxu0 }
 0x4c3   :  { %v571_v27 = vadd.f32 %v1090_v26, %v960_v25 }
 0x4c4   :  { %v565_v28 = vpop.f32.mrf.mxu0 }
 0x4c5   :  { %v577_v29 = vmin.f32 %v571_v27, 0.0  ;;  %v566_v30 = vadd.f32 %v960_v25, %v565_v28  ;;  %vm575_vm1 = vcmp.gt.f32.partialorder %v571_v27, 0.0 }
 0x4c7   :  { %v580_v31 = vmul.f32 1.442695, %v577_v29  ;;  %v576_v32 = vmin.f32 %v566_v30, 0.0  ;;  %vm574_vm0 = vcmp.gt.f32.partialorder %v566_v30, 0.0 }
 0x4c9   :  { %1194 = vpow2.f32 %v580_v31  ;;  %v578_v33 = vmul.f32 1.442695, %v576_v32 }
 0x4cb   :  { %1196 = vpow2.f32 %v578_v33 }
 0x4d6   :  { %v1195_v34 = vpop.eup %1194 }
 0x4d7   :  { %v964_v36 = vadd.f32 -1.0, %v1195_v34 }
 0x4d8   :  { %v1197_v35 = vpop.eup %1196 }
 0x4d9   :  { %v963_v37 = vadd.f32 -1.0, %v1197_v35  ;;  %v585_v39 = vsel %vm575_vm1, %v571_v27, %v964_v36 }
 0x4db   :  { %v584_v38 = vsel %vm574_vm0, %v566_v30, %v963_v37 }
 0x4dc   :  { %1123 = vmatprep.mubr.f32.mxu0 %v584_v38 }
 0x4dd   :  { %1124 = vmatmul.mubr.f32.vlgmr.msra.gmra.mxu0 %v585_v39 }
 0x59d   :  { %v1125_v41 = vpop.f32.mrf.mxu0 }
 0x59e   :  { %1137 = vmatprep.subr.mxu1 %v1125_v41 }
 0x59f   :  { %v668_v42 = vpop.f32.mrf.mxu0 }
 0x5a0   :  { %1134 = vmatprep.mubr.msk.f32.mxu1 %vm463_vm14, %v668_v42 }
 0x5a1   :  { %1135 = vmatmul.mubr.msk.f32.vlgmr.msra.gmra.mxu1 %vm463_vm14, %v1125_v41 }
 0x5a2   :  { %1138 = vmatpush3.msra.mxu1 %v1125_v41 }
 0x5a3   :  { %1139 = vmatprep.subr.mxu1 %v668_v42 }
 0x5a4   :  { %1140 = vmatpush3.msra.mxu1 %v668_v42 }
 0x661   :  { %v1136_v43 = vpop.f32.mrf.mxu1 }
 0x662   :  { %801 = vperm.xlu1 %1161, %v1136_v43  }
 0x663   :  { %v753_v44 = vpop.f32.mrf.mxu1 }
 0x664   :  { %796 = vperm.xlu0 %1160, %v753_v44  }
 0x68b   :  { %762 = vxpose.xlu1.b32.start [1/2] (short) (narrow) %v753_v44, 8 }
 0x68f   :  { %763 = vxpose.xlu1.b32.end [2/2] (short) (narrow) %v1136_v43, 8 }
 0x6dd   :  { %v802_v45 = vpop.permute.xlu1 %801 }
 0x6df   :  { %v797_v49 = vpop.permute.xlu0 %796 }
 0x707   :  { %v778_v46 = vpop.trf.xlu1 }
 0x708   :  { %v807_v48 = vrot.slane %v778_v46, %v262_v0 }
 0x70a   :  { %v808_v50 = vadd.f32 %v807_v48, %v797_v49  ;;  %v809_v51 = vadd.f32 %v807_v48, %v802_v45 }
 0x70c   :  { %vm810_vm3 = vcmp.gt.f32.partialorder %v808_v50, 0.0  ;;  %v812_v52 = vmul.f32 0.2, %v808_v50  ;;  %vm811_vm4 = vcmp.gt.f32.partialorder %v809_v51, 0.0  ;;  %v813_v53 = vmul.f32 0.2, %v809_v51 }
 0x70e   :  { %v814_v54 = vsel %vm810_vm3, %v808_v50, %v812_v52  ;;  %v815_v55 = vsel %vm811_vm4, %v809_v51, %v813_v53 }
 0x70f   :  { %v816_v56 = vsel %vm37_vm6, %v814_v54, -1e+30  ;;  %v817_v59 = vsel %vm38_vm2, %v815_v55, -1e+30 }
 0x710   :  { %v818_v58 = vsel %vm274_vm5, %v816_v56, -inf  ;;  %v821_v47 = vsel %vm274_vm5, %v817_v59, -inf }
 0x711   :  { %819 = vmax.xlane.f32.xlu0 %v818_v58 }
 0x715   :  { %822 = vmax.xlane.f32.xlu0 %v821_v47 }
 0x79a   :  { %v820_v0 = vpop.xlane.xlu0 %819 }
 0x79b   :  { %v824_v60 = vsub.f32 %v816_v56, %v820_v0 }
 0x79d   :  { %v826_v62 = vmul.f32 1.442695, %v824_v60 }
 0x79e   :  { %v823_v63 = vpop.xlane.xlu0 %822 }
 0x79f   :  { %1198 = vpow2.f32 %v826_v62  ;;  %v825_v1 = vsub.f32 %v817_v59, %v823_v63 }
 0x7a1   :  { %v828_v2 = vmul.f32 1.442695, %v825_v1 }
 0x7a3   :  { %1200 = vpow2.f32 %v828_v2 }
 0x7ac   :  { %v1199_v3 = vpop.eup %1198 }
 0x7ad   :  { %v830_v61 = vsel %vm274_vm5, %v1199_v3, 0.0 }
 0x7ae   :  { %831 = vadd.xlane.f32.xlu0 %v830_v61 }
 0x7b0   :  { %v1201_v4 = vpop.eup %1200 }
 0x7b1   :  { %v833_v5 = vsel %vm274_vm5, %v1201_v4, 0.0 }
 0x7b2   :  { %834 = vadd.xlane.f32.xlu0 %v833_v5 }
 0x837   :  { %v832_v57 = vpop.xlane.xlu0 %831 }
 0x838   :  { %v836_v6 = vmax.f32 %v832_v57, 1e-20 }
 0x83a   :  { %1202 = vrcp.f32 %v836_v6 }
 0x83b   :  { %v835_v7 = vpop.xlane.xlu0 %834 }
 0x83c   :  { %v837_v8 = vmax.f32 %v835_v7, 1e-20 }
 0x83e   :  { %1204 = vrcp.f32 %v837_v8 }
 0x847   :  { %v1203_v9 = vpop.eup %1202 }
 0x848   :  { %v840_v10 = vmul.f32 %v1203_v9, %v1199_v3 }
 0x84a   :  { %1141 = vmatprep.mubr.msk.f32.mxu1 %vm274_vm5, %v840_v10 }
 0x84b   :  { %v1205_v11 = vpop.eup %1204 }
 0x84c   :  { %v841_v12 = vmul.f32 %v1205_v11, %v1201_v4 }
 0x84e   :  { %1142 = vmatmul.mubr.msk.f32.vlgmr.msra.gmra.mxu1 %vm274_vm5, %v841_v12 }
 0x90e   :  { %v1143_v14 = vpop.f32.mrf.mxu1 }
 0x90f   :  { %v927_v15 = vadd.f32 %v1143_v14, %v967_v13 }
 0x910   :  { %v921_v16 = vpop.f32.mrf.mxu1 }
 0x911   :  { %v922_v17 = vadd.f32 %v967_v13, %v921_v16  ;;  %v931_v18 = vsel %vm463_vm14, %v927_v15, 0.0 }
 0x913   :  { %v930_v19 = vsel %vm463_vm14, %v922_v17, 0.0 }
 0x914   :  { %v932_v20 = vadd.f32 %v931_v18, %v930_v19 }
 0x916   :  { %v933_v21 = vrot.slane %v932_v20, 4 }
 0x918   :  { %v934_v22 = vadd.f32 %v933_v21, %v932_v20 }
 0x91a   :  { %v935_v23 = vrot.slane %v934_v22, 2 }
 0x91c   :  { %v936_v24 = vadd.f32 %v935_v23, %v934_v22 }
 0x91e   :  { %v937_v25 = vrot.slane %v936_v24, 1 }
 0x920   :  { %v938_v26 = vadd.f32 %v937_v25, %v936_v24 }
 0x922   :  { %v940_v27 = vmul.f32 0.0625, %v938_v26 }
 0x924   :  { %v941_v28 = vsel %vm463_vm14, %v940_v27, 0.0 }
 0x925   :  { %942 = vst [vmem:[#allocation2] sm:$0x1] %v941_v28 }
 0x926   :  { %1217 = shalt.err (!%p1214_p4)
}
 0x927   :  { %952 = dma.vmem_to_hbm [thread:$0]  %s950_s15, 16, %s1522_s9, [#allocation3]  }
 0x928   :  { %1226 = dma.done.wait [#allocation3], 16  }
 0x929   :  { %1227 = vsyncadd [#allocation3], 4294967280 }
 0x92a   :  { %956 = vsyncpa [#allocation3], 1 }

</bundles_post_ra>
